<compile_context>
chip_gen: v7x
topology: tpu7x:2x2x1
jax: 0.10.0
libtpu: 0.0.40
codegen_flags: <defaults>
</compile_context>

<pallas_src>
import jax
import jax.numpy as jnp
from jax import lax
from jax.experimental import pallas as pl
from jax.experimental.pallas import tpu as pltpu


def _round_up(x, m):
    return ((x + m - 1) // m) * m


def _vmem_limit(per_step_block_bytes):
    # Scoped-VMEM limit sized from the actual (double-buffered) per-step blocks
    # plus headroom, clamped to a range that is portable across v5e/v6e/v7x.
    need = 2 * per_step_block_bytes + (8 << 20)
    return int(min(max(need, 32 << 20), 64 << 20))


# -----------------------------------------------------------------------------
# Pass 1: 3x3 conv (bf16 MXU operands, f32 accumulation) + partial BN stats.
# -----------------------------------------------------------------------------
def _make_conv_stats_kernel(RB, W, Kp, Cp):
    def kernel(x_ref, w_ref, conv_ref, sum_ref, ssq_ref):
        # x_ref : ((RB + 2) * W, Kp) bf16  -- width-im2col rows (row = h*W + w),
        #                                     incl. one halo image row above/below.
        # w_ref : (3, Kp, Cp)        bf16  -- one (Kp, Cp) tap matrix per dh.
        acc = jnp.zeros((RB * W, Cp), jnp.float32)
        for dh in range(3):  # 3 static taps -> 3 MXU contractions, f32 accumulate
            xs = x_ref[pl.ds(dh * W, RB * W), :]  # contiguous, sublane-aligned
            acc = acc + jnp.dot(xs, w_ref[dh], preferred_element_type=jnp.float32)
        conv_ref[...] = acc

        # Partial BN statistics: fold down to (8, Cp) with pure VPU vreg-group
        # adds; the final 8->1 / cross-batch reduction happens outside (tiny).
        accg = acc.reshape(RB * W // 8, 8, Cp)
        sum_ref[...] = jnp.sum(accg, axis=0)
        ssq_ref[...] = jnp.sum(accg * accg, axis=0)

    return kernel


# -----------------------------------------------------------------------------
# Pass 2: BatchNorm affine (precomputed scale/shift) + ReLU + MaxPool2d(2).
# -----------------------------------------------------------------------------
def _make_bn_pool_kernel(G, W, Wo, Cp):
    def kernel(conv_ref, scale_ref, shift_ref, out_ref):
        # conv_ref : (2*G*W, Cp) f32 ; scale/shift : (1, Cp) f32
        y = conv_ref[...] * scale_ref[...] + shift_ref[...]   # affine before max
        # Vertical pool: vreg-aligned row blocks (W % 8 == 0) -> pure VPU max.
        y = y.reshape(G, 2, W, Cp)
        y = jnp.maximum(y[:, 0], y[:, 1])                     # (G, W, Cp)
        # Horizontal pool: pair even/odd columns (single sublane re-layout).
        # TODO(synk): if this reshape lowers to per-sublane shuffles, switch to
        # pltpu.roll(y, -1, axis=1) + a stride-2 select.
        y = y.reshape(G, Wo, 2, Cp)
        y = jnp.maximum(y[:, :, 0], y[:, :, 1])                # (G, Wo, Cp)
        out_ref[...] = jnp.maximum(y, 0.0)                     # ReLU (commutes)

    return kernel


def block_forward(x_nchw, w_oihw, gamma, beta, eps=1e-5):
    """Matches Block.forward(x) for an NCHW input and OIHW conv weight."""
    N, Cin, H, W = map(int, x_nchw.shape)
    Cout = int(w_oihw.shape[0])
    assert H % 2 == 0 and W % 2 == 0, "MaxPool2d(2) needs even H, W"
    assert W % 8 == 0, "this kernel assumes sublane-aligned image rows (W % 8 == 0)"
    Ho, Wo = H // 2, W // 2

    Cp = _round_up(Cout, 128)          # lane-dense output channels
    Kw = 3 * Cin                       # per-dh-tap contraction (width im2col)
    Kp = _round_up(Kw, 8)              # sublane-aligned weight rows

    RB = next(rb for rb in (8, 4, 2, 1) if H % rb == 0)     # conv rows / grid step
    nrb = H // RB
    G = next((g for g in (8, 4, 2, 1) if Ho % g == 0 and 2 * g * W <= 128), 1)
    n_pool = Ho // G                                         # pooled-row blocks

    f32, bf16 = jnp.float32, jnp.bfloat16

    # ---- layout glue (XLA): NCHW -> NHWC, halo pad, width-only im2col (3x, not
    #      9x), row-blocked with a one-row halo so pass-1 BlockSpecs are disjoint
    #      and fully pipelined. bf16 operands for the MXU.
    x_nhwc = jnp.transpose(x_nchw, (0, 2, 3, 1)).astype(bf16)
    xp = jnp.pad(x_nhwc, ((0, 0), (1, 1), (1, 1), (0, 0)))      # (N, H+2, W+2, Cin)
    xrow = jnp.concatenate([xp[:, :, dw:dw + W, :] for dw in range(3)], axis=-1)
    xrow = xrow.reshape(N, (H + 2) * W, Kw)                     # row index = h*W + w
    xrow = jnp.pad(xrow, ((0, 0), (0, 0), (0, Kp - Kw)))
    # TODO(synk): at production H, replace this halo duplication (~(RB+2)/RB extra
    # HBM bytes) with an overlapping pl.Element index_map or a manual halo DMA.
    xblk = jnp.stack(
        [xrow[:, r * RB * W:(r * RB + RB + 2) * W, :] for r in range(nrb)], axis=1
    )                                                           # (N, nrb, (RB+2)*W, Kp)

    w_hwio = jnp.transpose(w_oihw, (2, 3, 1, 0)).astype(bf16)   # (3, 3, Cin, Cout)
    w_taps = jnp.pad(w_hwio.reshape(3, Kw, Cout),
                     ((0, 0), (0, Kp - Kw), (0, Cp - Cout)))    # (3, Kp, Cp)

    gamma_p = jnp.pad(gamma.astype(f32), (0, Cp - Cout), constant_values=1.0)
    beta_p = jnp.pad(beta.astype(f32), (0, Cp - Cout))

    # ---- pass 1: conv + partial BN stats (gridded, double-buffered, parallel).
    blk1_bytes = ((RB + 2) * W * Kp * 2 + 3 * Kp * Cp * 2
                  + RB * W * Cp * 4 + 2 * 8 * Cp * 4)
    conv, sums, ssqs = pl.pallas_call(
        _make_conv_stats_kernel(RB, W, Kp, Cp),
        out_shape=(
            jax.ShapeDtypeStruct((N, H * W, Cp), f32),
            jax.ShapeDtypeStruct((N, nrb, 8, Cp), f32),
            jax.ShapeDtypeStruct((N, nrb, 8, Cp), f32),
        ),
        grid=(N, nrb),
        in_specs=[
            pl.BlockSpec((None, None, (RB + 2) * W, Kp), lambda n, r: (n, r, 0, 0)),
            pl.BlockSpec((3, Kp, Cp), lambda n, r: (0, 0, 0)),
        ],
        out_specs=(
            pl.BlockSpec((None, RB * W, Cp), lambda n, r: (n, r, 0)),
            pl.BlockSpec((None, None, 8, Cp), lambda n, r: (n, r, 0, 0)),
            pl.BlockSpec((None, None, 8, Cp), lambda n, r: (n, r, 0, 0)),
        ),
        compiler_params=pltpu.CompilerParams(
            dimension_semantics=("parallel", "parallel"),
            vmem_limit_bytes=_vmem_limit(blk1_bytes),
        ),
    )(xblk, w_taps)

    # ---- finalize BatchNorm statistics (tiny (Cp,) math between the passes).
    cnt = jnp.float32(N * H * W)
    s = jnp.sum(sums, axis=(0, 1, 2))
    ss = jnp.sum(ssqs, axis=(0, 1, 2))
    mean = s / cnt
    # Single-pass variance (clamped); f32 accumulation keeps this accurate here.
    var = jnp.maximum(ss / cnt - mean * mean, 0.0)
    g_inv = gamma_p * lax.rsqrt(var + eps)
    scale = g_inv.reshape(1, Cp)
    shift = (beta_p - mean * g_inv).reshape(1, Cp)

    # ---- pass 2: affine + ReLU + 2x2 max-pool (gridded, pipelined, parallel).
    blk2_bytes = 2 * G * W * Cp * 4 + 2 * Cp * 4 + G * Wo * Cp * 4
    pooled = pl.pallas_call(
        _make_bn_pool_kernel(G, W, Wo, Cp),
        out_shape=jax.ShapeDtypeStruct((N, Ho, Wo, Cp), f32),
        grid=(N, n_pool),
        in_specs=[
            pl.BlockSpec((None, 2 * G * W, Cp), lambda n, r: (n, r, 0)),
            pl.BlockSpec((1, Cp), lambda n, r: (0, 0)),
            pl.BlockSpec((1, Cp), lambda n, r: (0, 0)),
        ],
        out_specs=pl.BlockSpec((None, G, Wo, Cp), lambda n, r: (n, r, 0, 0)),
        compiler_params=pltpu.CompilerParams(
            dimension_semantics=("parallel", "parallel"),
            vmem_limit_bytes=_vmem_limit(blk2_bytes),
        ),
    )(conv, scale, shift)

    out = pooled[:, :, :, :Cout]                       # drop channel padding
    return jnp.transpose(out, (0, 3, 1, 2)).astype(x_nchw.dtype)


def reference_forward(x_nchw, w_oihw, gamma, beta, eps=1e-5):
    """Pure-JAX reference (same semantics) for correctness checking."""
    x = jnp.transpose(x_nchw, (0, 2, 3, 1))
    w = jnp.transpose(w_oihw, (2, 3, 1, 0))
    y = lax.conv_general_dilated(
        x, w, window_strides=(1, 1), padding=((1, 1), (1, 1)),
        dimension_numbers=("NHWC", "HWIO", "NHWC"),
        precision=lax.Precision.HIGHEST)
    mean = jnp.mean(y, axis=(0, 1, 2), keepdims=True)
    var = jnp.mean((y - mean) ** 2, axis=(0, 1, 2), keepdims=True)
    y = (y - mean) * lax.rsqrt(var + eps) * gamma + beta
    y = jnp.maximum(y, 0.0)
    N, H, W, C = y.shape
    y = y.reshape(N, H // 2, 2, W // 2, 2, C).max(axis=(2, 4))
    return jnp.transpose(y, (0, 3, 1, 2))


if __name__ == "__main__":
    # Small shapes consistent with the module: batch=2, n_in=4, n_out=8, 16x16.
    N, Cin, Cout, H, W = 2, 4, 8, 16, 16

    key = jax.random.PRNGKey(0)
    kx, kw, kg, kb = jax.random.split(key, 4)

    x = jax.random.normal(kx, (N, Cin, H, W), dtype=jnp.float32)
    conv_w = jax.random.normal(kw, (Cout, Cin, 3, 3), dtype=jnp.float32) * 0.1
    gamma = 1.0 + 0.1 * jax.random.normal(kg, (Cout,), dtype=jnp.float32)
    beta = 0.1 * jax.random.normal(kb, (Cout,), dtype=jnp.float32)

    out = jax.block_until_ready(block_forward(x, conv_w, gamma, beta))
    assert out.shape == (N, Cout, H // 2, W // 2), out.shape

    # The kernel feeds the MXU bf16 operands (f32 accumulation), so compare
    # against a full-precision reference evaluated on bf16-rounded operands.
    x_r = x.astype(jnp.bfloat16).astype(jnp.float32)
    w_r = conv_w.astype(jnp.bfloat16).astype(jnp.float32)
    ref = jax.block_until_ready(reference_forward(x_r, w_r, gamma, beta))
    err = float(jnp.max(jnp.abs(out - ref)))
    assert jnp.allclose(out, ref, atol=2e-3, rtol=2e-3), f"mismatch vs reference: {err}"

    print("KERNEL_OK")
</pallas_src>

<mosaic_0001>
module attributes {stable_mosaic.version = 11 : i64} {
  func.func @kernel(%arg0: i32, %arg1: i32, %arg2: memref<1x1x160x16xbf16, #tpu.memory_space<vmem>>, %arg3: memref<3x16x128xbf16, #tpu.memory_space<vmem>>, %arg4: memref<1x128x128xf32, #tpu.memory_space<vmem>>, %arg5: memref<1x1x8x128xf32, #tpu.memory_space<vmem>>, %arg6: memref<1x1x8x128xf32, #tpu.memory_space<vmem>>) attributes {dimension_semantics = [#tpu.dimension_semantics<parallel>, #tpu.dimension_semantics<parallel>], iteration_bounds = array<i64: 2, 2>, scalar_prefetch = 0 : i64, scratch_operands = 0 : i64, tpu.core_type = #tpu.core_type<tc>, window_params = [{transform_indices = @transform_0, window_bounds = array<i64: 1, 1, 160, 16>}, {pipeline_mode = #tpu.pipeline_mode<synchronous>, transform_indices = @transform_1, window_bounds = array<i64: 3, 16, 128>}, {transform_indices = @transform_2, window_bounds = array<i64: 1, 128, 128>}, {transform_indices = @transform_3, window_bounds = array<i64: 1, 1, 8, 128>}, {transform_indices = @transform_4, window_bounds = array<i64: 1, 1, 8, 128>}]} {
    %cst = arith.constant 0.000000e+00 : f32
    %0 = vector.broadcast %cst : f32 to vector<128x128xf32>
    %c0 = arith.constant 0 : index
    %c0_0 = arith.constant 0 : index
    %c0_1 = arith.constant 0 : index
    %c0_2 = arith.constant 0 : index
    %1 = vector.load %arg2[%c0, %c0_0, %c0_1, %c0_2] : memref<1x1x160x16xbf16, #tpu.memory_space<vmem>>, vector<1x1x128x16xbf16>
    %2 = vector.shape_cast %1 : vector<1x1x128x16xbf16> to vector<128x16xbf16>
    %c0_3 = arith.constant 0 : index
    %c0_4 = arith.constant 0 : index
    %c0_5 = arith.constant 0 : index
    %3 = vector.load %arg3[%c0_3, %c0_4, %c0_5] : memref<3x16x128xbf16, #tpu.memory_space<vmem>>, vector<1x16x128xbf16>
    %4 = vector.shape_cast %3 : vector<1x16x128xbf16> to vector<16x128xbf16>
    %cst_6 = arith.constant dense<0.000000e+00> : vector<128x128xf32>
    %5 = tpu.matmul %2, %4, %cst_6 {dimension_numbers = #tpu.dot_dimension_numbers<[1], [0], [0], [1], [0, 0, 1, 1], [], []>} : vector<128x16xbf16>, vector<16x128xbf16>, vector<128x128xf32> -> vector<128x128xf32>
    %6 = arith.addf %0, %5 : vector<128x128xf32>
    %c0_7 = arith.constant 0 : index
    %c0_8 = arith.constant 0 : index
    %c16 = arith.constant 16 : index
    %c0_9 = arith.constant 0 : index
    %7 = vector.load %arg2[%c0_7, %c0_8, %c16, %c0_9] : memref<1x1x160x16xbf16, #tpu.memory_space<vmem>>, vector<1x1x128x16xbf16>
    %8 = vector.shape_cast %7 : vector<1x1x128x16xbf16> to vector<128x16xbf16>
    %c1 = arith.constant 1 : index
    %c0_10 = arith.constant 0 : index
    %c0_11 = arith.constant 0 : index
    %9 = vector.load %arg3[%c1, %c0_10, %c0_11] : memref<3x16x128xbf16, #tpu.memory_space<vmem>>, vector<1x16x128xbf16>
    %10 = vector.shape_cast %9 : vector<1x16x128xbf16> to vector<16x128xbf16>
    %cst_12 = arith.constant dense<0.000000e+00> : vector<128x128xf32>
    %11 = tpu.matmul %8, %10, %cst_12 {dimension_numbers = #tpu.dot_dimension_numbers<[1], [0], [0], [1], [0, 0, 1, 1], [], []>} : vector<128x16xbf16>, vector<16x128xbf16>, vector<128x128xf32> -> vector<128x128xf32>
    %12 = arith.addf %6, %11 : vector<128x128xf32>
    %c0_13 = arith.constant 0 : index
    %c0_14 = arith.constant 0 : index
    %c32 = arith.constant 32 : index
    %c0_15 = arith.constant 0 : index
    %13 = vector.load %arg2[%c0_13, %c0_14, %c32, %c0_15] : memref<1x1x160x16xbf16, #tpu.memory_space<vmem>>, vector<1x1x128x16xbf16>
    %14 = vector.shape_cast %13 : vector<1x1x128x16xbf16> to vector<128x16xbf16>
    %c2 = arith.constant 2 : index
    %c0_16 = arith.constant 0 : index
    %c0_17 = arith.constant 0 : index
    %15 = vector.load %arg3[%c2, %c0_16, %c0_17] : memref<3x16x128xbf16, #tpu.memory_space<vmem>>, vector<1x16x128xbf16>
    %16 = vector.shape_cast %15 : vector<1x16x128xbf16> to vector<16x128xbf16>
    %cst_18 = arith.constant dense<0.000000e+00> : vector<128x128xf32>
    %17 = tpu.matmul %14, %16, %cst_18 {dimension_numbers = #tpu.dot_dimension_numbers<[1], [0], [0], [1], [0, 0, 1, 1], [], []>} : vector<128x16xbf16>, vector<16x128xbf16>, vector<128x128xf32> -> vector<128x128xf32>
    %18 = arith.addf %12, %17 : vector<128x128xf32>
    %c0_19 = arith.constant 0 : index
    %c0_20 = arith.constant 0 : index
    %c0_21 = arith.constant 0 : index
    %19 = vector.load %arg4[%c0_19, %c0_20, %c0_21] : memref<1x128x128xf32, #tpu.memory_space<vmem>>, vector<1x128x128xf32>
    %20 = vector.shape_cast %19 : vector<1x128x128xf32> to vector<128x128xf32>
    %21 = vector.shape_cast %18 : vector<128x128xf32> to vector<1x128x128xf32>
    tpu.vector_store %arg4[%c0_19, %c0_20, %c0_21], %21 {strides = array<i32>} : memref<1x128x128xf32, #tpu.memory_space<vmem>>, vector<1x128x128xf32>,
    %22 = vector.shape_cast %18 : vector<128x128xf32> to vector<16x8x128xf32>
    %cst_22 = arith.constant dense<0.000000e+00> : vector<8x128xf32>
    %23 = vector.multi_reduction <add>, %22, %cst_22 [0] : vector<16x8x128xf32> to vector<8x128xf32>
    %c0_23 = arith.constant 0 : index
    %c0_24 = arith.constant 0 : index
    %c0_25 = arith.constant 0 : index
    %c0_26 = arith.constant 0 : index
    %24 = vector.load %arg5[%c0_23, %c0_24, %c0_25, %c0_26] : memref<1x1x8x128xf32, #tpu.memory_space<vmem>>, vector<1x1x8x128xf32>
    %25 = vector.shape_cast %24 : vector<1x1x8x128xf32> to vector<8x128xf32>
    %26 = vector.shape_cast %23 : vector<8x128xf32> to vector<1x1x8x128xf32>
    tpu.vector_store %arg5[%c0_23, %c0_24, %c0_25, %c0_26], %26 {strides = array<i32>} : memref<1x1x8x128xf32, #tpu.memory_space<vmem>>, vector<1x1x8x128xf32>,
    %27 = arith.mulf %22, %22 : vector<16x8x128xf32>
    %cst_27 = arith.constant dense<0.000000e+00> : vector<8x128xf32>
    %28 = vector.multi_reduction <add>, %27, %cst_27 [0] : vector<16x8x128xf32> to vector<8x128xf32>
    %c0_28 = arith.constant 0 : index
    %c0_29 = arith.constant 0 : index
    %c0_30 = arith.constant 0 : index
    %c0_31 = arith.constant 0 : index
    %29 = vector.load %arg6[%c0_28, %c0_29, %c0_30, %c0_31] : memref<1x1x8x128xf32, #tpu.memory_space<vmem>>, vector<1x1x8x128xf32>
    %30 = vector.shape_cast %29 : vector<1x1x8x128xf32> to vector<8x128xf32>
    %31 = vector.shape_cast %28 : vector<8x128xf32> to vector<1x1x8x128xf32>
    tpu.vector_store %arg6[%c0_28, %c0_29, %c0_30, %c0_31], %31 {strides = array<i32>} : memref<1x1x8x128xf32, #tpu.memory_space<vmem>>, vector<1x1x8x128xf32>,
    return
  }
  func.func @transform_0(%arg0: i32, %arg1: i32) -> (i32, i32, i32, i32) {
    %c0_i32 = arith.constant 0 : i32
    %c0_i32_0 = arith.constant 0 : i32
    %c0_i32_1 = arith.constant 0 : i32
    return %arg0, %arg1, %c0_i32, %c0_i32_0 : i32, i32, i32, i32
  }
  func.func @transform_1(%arg0: i32, %arg1: i32) -> (i32, i32, i32) {
    %c0_i32 = arith.constant 0 : i32
    %c0_i32_0 = arith.constant 0 : i32
    %c0_i32_1 = arith.constant 0 : i32
    %c0_i32_2 = arith.constant 0 : i32
    return %c0_i32, %c0_i32_0, %c0_i32_1 : i32, i32, i32
  }
  func.func @transform_2(%arg0: i32, %arg1: i32) -> (i32, i32, i32) {
    %c0_i32 = arith.constant 0 : i32
    %c0_i32_0 = arith.constant 0 : i32
    return %arg0, %arg1, %c0_i32 : i32, i32, i32
  }
  func.func @transform_3(%arg0: i32, %arg1: i32) -> (i32, i32, i32, i32) {
    %c0_i32 = arith.constant 0 : i32
    %c0_i32_0 = arith.constant 0 : i32
    %c0_i32_1 = arith.constant 0 : i32
    return %arg0, %arg1, %c0_i32, %c0_i32_0 : i32, i32, i32, i32
  }
  func.func @transform_4(%arg0: i32, %arg1: i32) -> (i32, i32, i32, i32) {
    %c0_i32 = arith.constant 0 : i32
    %c0_i32_0 = arith.constant 0 : i32
    %c0_i32_1 = arith.constant 0 : i32
    return %arg0, %arg1, %c0_i32, %c0_i32_0 : i32, i32, i32, i32
  }
}

</mosaic_0001>

<bundles_post_ra>
// kernel: tpu_custom_call.1
= control target key start
LH: loop header
LB: loop body
LE: loop exit
PB: predicated region body
PF: predicated region fallthrough
CT: control target
= control target key end

     0   :  { %s1809_s0 = inlined_call_operand.vmem [shape: bf16[2,2,160,16], index: 0, kind: input, shape index: {}]   ;;  %s1810_s1 = inlined_call_operand.vmem [shape: bf16[3,16,128], index: 1, kind: input, shape index: {}]   ;;  %s1811_s2 = inlined_call_operand.hbm [shape: f32[2,256,128], index: 2, kind: output, shape index: {0}]   ;;  %s1812_s3 = inlined_call_operand.hbm [shape: f32[2,2,8,128], index: 3, kind: output, shape index: {1}]   ;;  %s1813_s4 = inlined_call_operand.hbm [shape: f32[2,2,8,128], index: 4, kind: output, shape index: {2}]  }
   0x1   :  { %1816 = sst [smem:[#allocation9_spill]] %s1809_s0 }
   0x2   :  { %1817 = sst [smem:[#allocation10_spill]] %s1810_s1 }
   0x3   :  { %10 = vsyncpa [#allocation3], 0 }
   0x4   :  { %12 = vsyncpa [#allocation3 + $0x1], 0 }
   0x5   :  { %13 = vsyncpa [#allocation5], 0 }
   0x6   :  { %15 = vsyncpa [#allocation5 + $0x1], 0  ;;  %s1497_s15 = smov 0   ;;  %s1499_s16 = smov 0  }
   0x7   :  { %s1501_s17 = smov 0   ;;  %s1503_s18 = smov 0  }
   0x8   :  { %s1505_s19 = smov 0   ;;  %s1507_s20 = smov 0  }
   0x9   :  { %s1509_s21 = smov 0   ;;  %s1511_s22 = smov 0  }
   0xa LB: > { %s1022_s23 = sadd.s32 4294967295, %s1465_s22   ;;  %s1814_s24 = sadd.s32 4294967294, %s1465_s22   ;;  %s1465_s22 = sphi %s1511_s22, %s21_s22   ;;  %s1461_s21 = sphi %s1509_s21, %s1833_s21   ;;  %s1457_s20 = sphi %s1507_s20, %s1832_s20   ;;  %s1453_s19 = sphi %s1505_s19, %s1831_s19   ;;  %s1449_s18 = sphi %s1503_s18, %s1830_s18   ;;  %s1445_s17 = sphi %s1501_s17, %s1829_s17   ;;  %s1441_s16 = sphi %s1499_s16, %s1828_s16   ;;  %s1437_s15 = sphi %s1497_s15, %s1827_s15  }
   0xb   : > { %s30_s25 = sadd.s32 1, %s1457_s20  ;;  %s33_s26 = sadd.s32 1, %s1461_s21 }
   0xc   : > { %p31_p0 = scmp.ge.s32.totalorder %s30_s25, 2  ;;  %p101_p1 = scmp.ne.s32.totalorder %s1445_s17, %s1441_s16 }
   0xd   : > { %p102_p2 = scmp.eq.s32.totalorder %s1022_s23, 3  ;;  %p107_p5 = scmp.ne.s32.totalorder %s1441_s16, %s1437_s15 }
   0xe   : > { %s1835_s25 = smov (%p31_p0, %s30_s25), 0  ;;  %s1837_s26 = smov (!%p31_p0, %s33_s26), %s1461_s21 }
   0xf   : > { %s87_s27 = ssub.s32 %s1457_s20, %s1835_s25  ;;  %p1550_p3 = por %p102_p2, %p101_p1 }
  0x10   : > { %p35_p4 = scmp.ge.s32.totalorder %s1837_s26, 2  ;;  %p108_p6 = scmp.eq.s32.totalorder %s1814_s24, 3 }
  0x11   : > { %p1026_p7 = scmp.ge.s32.totalorder %s1465_s22, 1  ;;  %p197_p9 = scmp.lt.s32.totalorder %s1465_s22, 5 }
  0x12   : > { %s1839_s26 = smov (%p35_p4, %s1837_s26), 0  ;;  %p1561_p8 = por %p108_p6, %p107_p5 }
  0x13   : > { %s86_s30 = ssub.s32 %s1461_s21, %s1839_s26  ;;  %s91_s5 = sadd.s32 1, %s1445_s17 }
  0x14   : > { %s88_s6 = sor.u32 %s87_s27, %s86_s30  ;;  %p198_p10 = pnand %p1026_p7, %p197_p9 }
  0x15   : > { %p89_p11 = scmp.eq.s32.totalorder %s88_s6, 0  ;;  %s1820_s1 = sld [smem:[#allocation10_spill]] (!%p198_p10)  ;;  %vm317_vm0 = vcmask (!%p198_p10), 130048  }
  0x16   : > { %201 = sbr.rel (%p198_p10) target bundleno = 360 (0x168), region = 28  ;;  %p237_p12 = scmp.lt.s32.totalorder (!%p198_p10), %s1453_s19, 1 }
  0x17   : > { %s1570_s7 = scalar_select %p89_p11, %s1445_s17, %s91_s5  }
  0x18   : > { %p239_p13 = scmp.lt.s32.totalorder (!%p198_p10), %s1449_s18, 1  ;;  %s1821_s0 = sld [smem:[#allocation9_spill]] (!%p198_p10) }
  0x19   : > { %s1082_s27 = sshll.u32 (!%p198_p10), %s1449_s18, 4 }
  0x1b   : > { %v1291_v0 = vld [vmem:[%s1820_s1 + $0x8] sm:$0xff] (!%p198_p10)   ;;  %v1292_v1 = vld [vmem:[%s1820_s1] sm:$0xff] (!%p198_p10)   ;;  %v1295_v2 = vld [vmem:[%s1820_s1 + $0x10] sm:$0xff] (!%p198_p10)  }
  0x1c   : > { %1118 = vmatprep.subr.bf16.mxu1 (!%p198_p10), %v1291_v0  ;;  %1136 = vmatprep.subr.bf16.mxu0 (!%p198_p10), %v1292_v1 }
  0x1d   : > { %s238_s12 = scalar_select %p237_p12, %s1453_s19, 1  ;;  %1119 = vmatpush3.bf16.msra.mxu1 %v1291_v0  ;;  %1137 = vmatpush3.bf16.msra.mxu0 %v1292_v1 }
  0x1e   : > { %s240_s13 = scalar_select %p239_p13, %s1449_s18, 1  ;;  %1172 = vmatprep.subr.bf16.mxu1 %v1292_v1  ;;  %1154 = vmatprep.subr.bf16.mxu0 %v1295_v2 }
  0x1f   : > { %s1207_s30 = smul.u32 40, %s238_s12  ;;  %s1632_s12 = sand.u32 1, %s1441_s16  }
  0x20   : > { %s1206_s5 = smul.u32 20, %s240_s13  ;;  %s1027_s13 = sshll.u32 %s1632_s12, 7 }
  0x21   : > { %s1635_s14 = scalar_lea.vmem [#allocation2], %s1027_s13  ;;  %s1467_s13 = smov [#allocation2]  }
  0x22   : > { %s243_s6 = sadd.s32 %s1207_s30, %s1206_s5  ;;  %s1083_s30 = sshll.u32 %s1453_s19, 5 }
  0x23   : > { %s1030_s8 = sshll.u32 %s243_s6, 2  ;;  %s1650_s5 = sadd.s32 %s1083_s30, %s1082_s27 }
  0x24   : > { %s1588_s11 = scalar_lea.vmem %s1821_s0, %s1030_s8  ;;  %s1815_s6 = sshll.u32 %s1632_s12, 3 }
  0x25   : > { %v1293_v3 = vld [vmem:[%s1588_s11 + $0x8] sm:$0xff]   ;;  %v1294_v4 = vld [vmem:[%s1588_s11] sm:$0xff]   ;;  %v1296_v5 = vld [vmem:[%s1588_s11 + $0x10] sm:$0xff]   ;;  %s1085_s8 = sshll.u32 %s1453_s19, 1  ;;  %s1084_s9 = sshll.u32 %s1650_s5, 7 }
  0x26   : > { %1120 = vmatprep.mubr.msk.bf16.mxu1 %vm317_vm0, %v1293_v3  ;;  %1138 = vmatprep.mubr.msk.bf16.mxu0 %vm317_vm0, %v1294_v4  ;;  %v1297_v6 = vld [vmem:[%s1588_s11 + $0x18] sm:$0xff]   ;;  %v1298_v7 = vld [vmem:[%s1588_s11 + $0x20] sm:$0xff]   ;;  %v1299_v8 = vld [vmem:[%s1588_s11 + $0x28] sm:$0xff]   ;;  %s842_s10 = sshll.u32 %s1635_s14, 4  ;;  %s1658_s19 = sadd.s32 %s1449_s18, %s1085_s8  ;;  %s1666_s10 = int_to_ptr.vmem [resolvable:$true] %s842_s10 }
  0x27   : > { %1121 = vmatmul.mubr.msk.bf16.vlgmr.msra.gmra.mrb[0].mxu1 %vm317_vm0, %v1296_v5  ;;  %1139 = vmatmul.mubr.msk.bf16.vlgmr.msra.gmra.mrb[0].mxu0 %vm317_vm0, %v1293_v3  ;;  %v1300_v9 = vld [vmem:[%s1588_s11 + $0x10] sm:$0xff]   ;;  %v1302_v11 = vld [vmem:[%s1588_s11 + $0x18] sm:$0xff]   ;;  %v1304_v13 = vld [vmem:[%s1588_s11 + $0x20] sm:$0xff]   ;;  %s1664_s27 = scalar_lea.hbm %s1811_s2, %s1084_s9  ;;  %s1672_s18 = sand.u32 1, %s1022_s23  }
  0x28   : > { %1173 = vmatpush3.bf16.msra.mxu1 %v1292_v1  ;;  %1155 = vmatpush3.bf16.msra.mxu0 %v1295_v2  ;;  %v1301_v10 = vld [vmem:[%s1588_s11 + $0x30] sm:$0xff]   ;;  %v1303_v12 = vld [vmem:[%s1588_s11 + $0x38] sm:$0xff]   ;;  %v1305_v14 = vld [vmem:[%s1588_s11 + $0x40] sm:$0xff]   ;;  %s1678_s5 = scalar_lea.vmem [#allocation4], %s1815_s6  ;;  %s817_s9 = scalar_lea.sflag [#allocation3], %s1632_s12 }
  0x29   : > { %1124 = vmatprep.mubr.msk.bf16.mxu1 %vm317_vm0, %v1297_v6  ;;  %1142 = vmatprep.mubr.msk.bf16.mxu0 %vm317_vm0, %v1296_v5  ;;  %v1306_v15 = vld [vmem:[%s1588_s11 + $0x28] sm:$0xff]   ;;  %v1307_v16 = vld [vmem:[%s1588_s11 + $0x30] sm:$0xff]   ;;  %v1308_v17 = vld [vmem:[%s1588_s11 + $0x38] sm:$0xff]   ;;  %s1315_s23 = sshll.u32 %s1467_s13, 4  ;;  %s1316_s23 = int_to_ptr.vmem [resolvable:$false] %s1315_s23 }
  0x2a   : > { %v1309_v18 = vld [vmem:[%s1588_s11 + $0x40] sm:$0xff]   ;;  %v1310_v19 = vld [vmem:[%s1588_s11 + $0x48] sm:$0xff]   ;;  %s1311_s11 = scalar_lea.vmem %s1666_s10, 2048  ;;  %s1317_s24 = scalar_lea.vmem %s1316_s23, 4096 }
  0x2b   : > { %p1312_p0 = scmp.ne.s32.totalorder %s1666_s10, %s1311_s11  ;;  %p1318_p4 = scmp.lt.s32.totalorder %s1666_s10, %s1316_s23 }
  0x2c   : > { %p1319_p5 = scmp.lt.s32.totalorder %s1317_s24, %s1311_s11 }
  0x2d   : > { %p1313_p1 = pnand %p1312_p0, %p1550_p3 }
  0x2e   : > { %p1320_p6 = por %p1319_p5, %p1318_p4 }
  0x2f   : > { %1125 = vmatmul.mubr.msk.bf16.gmra.mrb[4].mxu1 %vm317_vm0, %v1298_v7  ;;  %1143 = vmatmul.mubr.msk.bf16.gmra.mrb[4].mxu0 %vm317_vm0, %v1297_v6  ;;  %p1314_p2 = pneg %p1313_p1 }
  0x30   : > { %1128 = vmatprep.mubr.msk.bf16.mxu1 %vm317_vm0, %v1299_v8  ;;  %1156 = vmatprep.mubr.msk.bf16.mxu0 %vm317_vm0, %v1300_v9 }
  0x31   : > { %p1321_p7 = pnand %p1320_p6, %p1314_p2 }
  0x37   : > { %1129 = vmatmul.mubr.msk.bf16.gmra.mrb[8].mxu1 %vm317_vm0, %v1301_v10  ;;  %1157 = vmatmul.mubr.msk.bf16.vlgmr.msra.gmra.mrb[0].mxu0 %vm317_vm0, %v1302_v11 }
  0x38   : > { %1132 = vmatprep.mubr.msk.bf16.mxu1 %vm317_vm0, %v1303_v12  ;;  %1160 = vmatprep.mubr.msk.bf16.mxu0 %vm317_vm0, %v1304_v13 }
  0x3f   : > { %1133 = vmatmul.mubr.msk.bf16.gmra.mrb[12].mxu1 %vm317_vm0, %v1305_v14  ;;  %1161 = vmatmul.mubr.msk.bf16.gmra.mrb[4].mxu0 %vm317_vm0, %v1306_v15 }
  0x40   : > { %1146 = vmatprep.mubr.msk.bf16.mxu1 %vm317_vm0, %v1298_v7  ;;  %1164 = vmatprep.mubr.msk.bf16.mxu0 %vm317_vm0, %v1307_v16 }
  0x47   : > { %1147 = vmatmul.mubr.msk.bf16.vlgmr.msra.gmra.mrb[8].mxu1 %vm317_vm0, %v1299_v8  ;;  %1165 = vmatmul.mubr.msk.bf16.gmra.mrb[8].mxu0 %vm317_vm0, %v1308_v17 }
  0x48   : > { %1150 = vmatprep.mubr.msk.bf16.mxu1 %vm317_vm0, %v1301_v10  ;;  %1168 = vmatprep.mubr.msk.bf16.mxu0 %vm317_vm0, %v1309_v18 }
  0x4f   : > { %1151 = vmatmul.mubr.msk.bf16.gmra.mrb[12].mxu1 %vm317_vm0, %v1303_v12  ;;  %1169 = vmatmul.mubr.msk.bf16.gmra.mrb[12].mxu0 %vm317_vm0, %v1310_v19 }
  0xfa   : > { %v1122_v20 = vpop.f32.mrb[0].mxu1 }
  0xfb   : > { %v376_v21 = vpop.f32.mrb[1].mxu1 }
  0xfc   : > { %v1123_v22 = vpop.f32.mrb[2].mxu1 }
  0xfd   : > { %v379_v23 = vpop.f32.mrb[3].mxu1 }
 0x102   : > { %v1126_v24 = vpop.f32.mrb[4].mxu1 }
 0x103   : > { %v392_v25 = vpop.f32.mrb[5].mxu1 }
 0x104   : > { %v1127_v26 = vpop.f32.mrb[6].mxu1 }
 0x105   : > { %v395_v27 = vpop.f32.mrb[7].mxu1 }
 0x10a   : > { %v1158_v28 = vpop.f32.mrb[0].mxu0 }
 0x10b   : > { %v1174_v29 = vadd.f32 %v1158_v28, %v1122_v20  ;;  %v673_v30 = vpop.f32.mrb[1].mxu0 }
 0x10c   : > { %v1175_v31 = vadd.f32 %v673_v30, %v376_v21  ;;  %v1159_v32 = vpop.f32.mrb[2].mxu0 }
 0x10d   : > { %754 = vst [vmem:[%s1635_s14 + $0x10] sm:$0xff] %v1174_v29  ;;  %v1176_v33 = vadd.f32 %v1159_v32, %v1123_v22  ;;  %v676_v34 = vpop.f32.mrb[3].mxu0  ;;  %v786_v39 = vmul.f32 %v1174_v29, %v1174_v29 }
 0x10e   : > { %752 = vst [vmem:[%s1635_s14] sm:$0xff] %v1175_v31  ;;  %v1177_v35 = vadd.f32 %v676_v34, %v379_v23  ;;  %v784_v36 = vmul.f32 %v1175_v31, %v1175_v31 }
 0x10f   : > { %755 = vst [vmem:[%s1635_s14 + $0x18] sm:$0xff] %v1176_v33  ;;  %v787_v45 = vmul.f32 %v1176_v33, %v1176_v33 }
 0x110   : > { %753 = vst [vmem:[%s1635_s14 + $0x8] sm:$0xff] %v1177_v35  ;;  %v768_v37 = vadd.f32 %v1177_v35, %v1175_v31  ;;  %v785_v38 = vmul.f32 %v1177_v35, %v1177_v35 }
 0x112   : > { %v769_v40 = vadd.f32 %v1174_v29, %v768_v37  ;;  %v800_v41 = vadd.f32 %v785_v38, %v784_v36  ;;  %v1162_v42 = vpop.f32.mrb[4].mxu0 }
 0x113   : > { %v1178_v43 = vadd.f32 %v1162_v42, %v1126_v24  ;;  %v689_v44 = vpop.f32.mrb[5].mxu0 }
 0x114   : > { %v801_v46 = vadd.f32 %v800_v41, %v786_v39  ;;  %v1179_v47 = vadd.f32 %v689_v44, %v392_v25  ;;  %v770_v48 = vadd.f32 %v1176_v33, %v769_v40  ;;  %v1163_v49 = vpop.f32.mrb[6].mxu0 }
 0x115   : > { %758 = vst [vmem:[%s1635_s14 + $0x30] sm:$0xff] %v1178_v43  ;;  %v1180_v50 = vadd.f32 %v1163_v49, %v1127_v26  ;;  %v692_v51 = vpop.f32.mrb[7].mxu0  ;;  %v790_v59 = vmul.f32 %v1178_v43, %v1178_v43 }
 0x116   : > { %756 = vst [vmem:[%s1635_s14 + $0x20] sm:$0xff] %v1179_v47  ;;  %v771_v52 = vadd.f32 %v1179_v47, %v770_v48  ;;  %v788_v53 = vmul.f32 %v1179_v47, %v1179_v47  ;;  %v802_v54 = vadd.f32 %v801_v46, %v787_v45  ;;  %v1181_v55 = vadd.f32 %v692_v51, %v395_v27 }
 0x117   : > { %759 = vst [vmem:[%s1635_s14 + $0x38] sm:$0xff] %v1180_v50  ;;  %v791_v3 = vmul.f32 %v1180_v50, %v1180_v50 }
 0x118   : > { %v803_v56 = vadd.f32 %v802_v54, %v788_v53  ;;  %757 = vst [vmem:[%s1635_s14 + $0x28] sm:$0xff] %v1181_v55  ;;  %v772_v57 = vadd.f32 %v1181_v55, %v771_v52  ;;  %v789_v58 = vmul.f32 %v1181_v55, %v1181_v55 }
 0x11a   : > { %v773_v60 = vadd.f32 %v1178_v43, %v772_v57  ;;  %v804_v61 = vadd.f32 %v803_v56, %v789_v58  ;;  %v1148_v62 = vpop.f32.mrb[8].mxu1  ;;  %v1166_v63 = vpop.f32.mrb[8].mxu0 }
 0x11b   : > { %v1182_v0 = vadd.f32 %v1166_v63, %v1148_v62  ;;  %v519_v1 = vpop.f32.mrb[9].mxu1  ;;  %v705_v2 = vpop.f32.mrb[9].mxu0 }
 0x11c   : > { %v805_v4 = vadd.f32 %v804_v61, %v790_v59  ;;  %v1183_v5 = vadd.f32 %v705_v2, %v519_v1  ;;  %v774_v6 = vadd.f32 %v1180_v50, %v773_v60  ;;  %v1149_v7 = vpop.f32.mrb[10].mxu1  ;;  %v1167_v8 = vpop.f32.mrb[10].mxu0 }
 0x11d   : > { %762 = vst [vmem:[%s1635_s14 + $0x50] sm:$0xff] %v1182_v0  ;;  %v1184_v9 = vadd.f32 %v1167_v8, %v1149_v7  ;;  %v522_v10 = vpop.f32.mrb[11].mxu1  ;;  %v708_v11 = vpop.f32.mrb[11].mxu0  ;;  %v794_v19 = vmul.f32 %v1182_v0, %v1182_v0 }
 0x11e   : > { %760 = vst [vmem:[%s1635_s14 + $0x40] sm:$0xff] %v1183_v5  ;;  %v775_v12 = vadd.f32 %v1183_v5, %v774_v6  ;;  %v792_v13 = vmul.f32 %v1183_v5, %v1183_v5  ;;  %v806_v14 = vadd.f32 %v805_v4, %v791_v3  ;;  %v1185_v15 = vadd.f32 %v708_v11, %v522_v10 }
 0x11f   : > { %763 = vst [vmem:[%s1635_s14 + $0x58] sm:$0xff] %v1184_v9  ;;  %v795_v27 = vmul.f32 %v1184_v9, %v1184_v9 }
 0x120   : > { %v807_v16 = vadd.f32 %v806_v14, %v792_v13  ;;  %761 = vst [vmem:[%s1635_s14 + $0x48] sm:$0xff] %v1185_v15  ;;  %v776_v17 = vadd.f32 %v1185_v15, %v775_v12  ;;  %v793_v18 = vmul.f32 %v1185_v15, %v1185_v15 }
 0x122   : > { %v777_v20 = vadd.f32 %v1182_v0, %v776_v17  ;;  %v808_v21 = vadd.f32 %v807_v16, %v793_v18  ;;  %v1152_v22 = vpop.f32.mrb[12].mxu1  ;;  %v1170_v23 = vpop.f32.mrb[12].mxu0 }
 0x123   : > { %v1186_v24 = vadd.f32 %v1170_v23, %v1152_v22  ;;  %v535_v25 = vpop.f32.mrb[13].mxu1  ;;  %v721_v26 = vpop.f32.mrb[13].mxu0 }
 0x124   : > { %v809_v28 = vadd.f32 %v808_v21, %v794_v19  ;;  %v1187_v29 = vadd.f32 %v721_v26, %v535_v25  ;;  %v778_v30 = vadd.f32 %v1184_v9, %v777_v20  ;;  %v1153_v31 = vpop.f32.mrb[14].mxu1  ;;  %v1171_v32 = vpop.f32.mrb[14].mxu0 }
 0x125   : > { %766 = vst [vmem:[%s1635_s14 + $0x70] sm:$0xff] %v1186_v24  ;;  %v1188_v33 = vadd.f32 %v1171_v32, %v1153_v31  ;;  %v538_v34 = vpop.f32.mrb[15].mxu1  ;;  %v724_v35 = vpop.f32.mrb[15].mxu0 }
 0x126   : > { %764 = vst [vmem:[%s1635_s14 + $0x60] sm:$0xff] %v1187_v29  ;;  %v779_v36 = vadd.f32 %v1187_v29, %v778_v30  ;;  %v796_v37 = vmul.f32 %v1187_v29, %v1187_v29  ;;  %v810_v38 = vadd.f32 %v809_v28, %v795_v27  ;;  %v1189_v39 = vadd.f32 %v724_v35, %v538_v34 }
 0x127   : > { %767 = vst [vmem:[%s1635_s14 + $0x78] sm:$0xff] %v1188_v33 }
 0x128   : > { %v811_v40 = vadd.f32 %v810_v38, %v796_v37  ;;  %765 = vst [vmem:[%s1635_s14 + $0x68] sm:$0xff] %v1189_v39  ;;  %v780_v41 = vadd.f32 %v1189_v39, %v779_v36  ;;  %v797_v42 = vmul.f32 %v1189_v39, %v1189_v39 }
 0x129   : > { %1324 = shalt.err (!%p1321_p7)
}
 0x12a   : > { %s1325_s14 = scalar_lea.hbm %s1664_s27, 2048  ;;  %s1329_s13 = scalar_lea.hbm %s1811_s2, 8192 }
 0x12b   : > { %p1326_p9 = scmp.ne.s32.totalorder %s1664_s27, %s1325_s14  ;;  %p1330_p12 = scmp.lt.u32.totalorder %s1664_s27, %s1811_s2 }
 0x12c   : > { %p1331_p13 = scmp.lt.u32.totalorder %s1329_s13, %s1325_s14  ;;  %p1333_p1 = scmp.lt.u32.totalorder %s1325_s14, %s1664_s27 }
 0x12d   : > { %p1327_p10 = pnand %p1326_p9, %p1550_p3 }
 0x12e   : > { %p1332_p0 = por %p1331_p13, %p1330_p12 }
 0x12f   : > { %p1328_p11 = pneg %p1327_p10 }
 0x130   : > { %p1334_p2 = por %p1333_p1, %p1332_p0 }
 0x132   : > { %p1335_p4 = pnand %p1334_p2, %p1328_p11 }
 0x134   : > { %1338 = shalt.err (!%p1335_p4)
}
 0x135   : > { %s1468_s24 = smov 128   ;;  %s1469_s30 = smov 8   ;;  %v798_v43 = vmul.f32 %v1186_v24, %v1186_v24  ;;  %v781_v44 = vadd.f32 %v1186_v24, %v780_v41  ;;  %v812_v45 = vadd.f32 %v811_v40, %v797_v42  ;;  %v799_v46 = vmul.f32 %v1188_v33, %v1188_v33 }
 0x136   : > { %1208 = dma.vmem_to_hbm [thread:$0]  (%p1550_p3), %s1666_s10, 2048, %s1664_s27, %s817_s9, %s1468_s24, %s1468_s24, %s1469_s30  }
 0x137   : > { %s1822_s6 = sshll.u32 %s1632_s12, 3  ;;  %v813_v47 = vadd.f32 %v812_v45, %v798_v43  ;;  %v782_v48 = vadd.f32 %v1188_v33, %v781_v44  ;;  %s1823_s14 = sshll.u32 %s1658_s19, 7 }
 0x138   : > { %s1707_s8 = scalar_lea.vmem [#allocation6], %s1822_s6  ;;  %s1715_s0 = scalar_lea.hbm %s1812_s3, %s1823_s14 }
 0x139   : > { %s875_s11 = sshll.u32 %s1707_s8, 4  ;;  %s1824_s1 = sshll.u32 %s1678_s5, 4  ;;  %783 = vst [vmem:[%s1678_s5] sm:$0xff] %v782_v48  ;;  %v814_v49 = vadd.f32 %v813_v47, %v799_v46  ;;  %s1719_s1 = int_to_ptr.vmem [resolvable:$true] %s1824_s1  ;;  %s1729_s11 = int_to_ptr.vmem [resolvable:$true] %s875_s11 }
 0x13a   : > { %s1825_s12 = smov %s1823_s14  ;;  %s822_s24 = scalar_lea.sflag [#allocation5], %s1672_s18 }
 0x13b   : > { %s1727_s9 = scalar_lea.hbm %s1813_s4, %s1825_s12  ;;  %s1339_s30 = scalar_lea.vmem %s1719_s1, 128 }
 0x13c   : > { %p1340_p5 = scmp.ne.s32.totalorder %s1719_s1, %s1339_s30  ;;  %s1470_s6 = smov [#allocation4]  }
 0x13d   : > { %s1343_s14 = sshll.u32 %s1470_s6, 4  ;;  %s1344_s14 = int_to_ptr.vmem [resolvable:$false] %s1343_s14 }
 0x13e   : > { %p1341_p6 = pnand %p1340_p5, %p1550_p3  ;;  %s1345_s13 = scalar_lea.vmem %s1344_s14, 256 }
 0x13f   : > { %p1346_p9 = scmp.lt.s32.totalorder %s1719_s1, %s1344_s14  ;;  %p1347_p10 = scmp.lt.s32.totalorder %s1345_s13, %s1339_s30 }
 0x140   : > { %p1342_p7 = pneg %p1341_p6 }
 0x141   : > { %p1348_p11 = por %p1347_p10, %p1346_p9 }
 0x143   : > { %p1349_p12 = pnand %p1348_p11, %p1342_p7 }
 0x145   : > { %1352 = shalt.err (!%p1349_p12)
}
 0x146   : > { %s1353_s19 = scalar_lea.hbm %s1715_s0, 128  ;;  %s1357_s12 = scalar_lea.hbm %s1812_s3, 512 }
 0x147   : > { %p1354_p13 = scmp.ne.s32.totalorder %s1715_s0, %s1353_s19  ;;  %p1358_p2 = scmp.lt.u32.totalorder %s1715_s0, %s1812_s3 }
 0x148   : > { %p1359_p4 = scmp.lt.u32.totalorder %s1357_s12, %s1353_s19  ;;  %p1361_p6 = scmp.lt.u32.totalorder %s1353_s19, %s1715_s0 }
 0x149   : > { %p1355_p0 = pnand %p1354_p13, %p1550_p3 }
 0x14a   : > { %p1360_p5 = por %p1359_p4, %p1358_p2 }
 0x14b   : > { %p1356_p1 = pneg %p1355_p0 }
 0x14c   : > { %p1362_p7 = por %p1361_p6, %p1360_p5 }
 0x14e   : > { %p1363_p9 = pnand %p1362_p7, %p1356_p1 }
 0x150   : > { %1366 = shalt.err (!%p1363_p9)
}
 0x151   : > { %1209 = dma.vmem_to_hbm [thread:$0]  (%p1550_p3), %s1719_s1, 128, %s1715_s0, %s822_s24   ;;  %815 = vst [vmem:[%s1707_s8] sm:$0xff] %v814_v49 }
 0x152   : > { %s1367_s30 = scalar_lea.vmem %s1729_s11, 128  ;;  %s1471_s6 = smov [#allocation6]  }
 0x153   : > { %p1368_p10 = scmp.ne.s32.totalorder %s1729_s11, %s1367_s30  ;;  %s1371_s14 = sshll.u32 %s1471_s6, 4  ;;  %s1372_s14 = int_to_ptr.vmem [resolvable:$false] %s1371_s14 }
 0x154   : > { %s1373_s13 = scalar_lea.vmem %s1372_s14, 256  ;;  %p1374_p13 = scmp.lt.s32.totalorder %s1729_s11, %s1372_s14 }
 0x155   : > { %p1369_p11 = pnand %p1368_p10, %p1550_p3  ;;  %p1375_p0 = scmp.lt.s32.totalorder %s1373_s13, %s1367_s30 }
 0x157   : > { %p1370_p12 = pneg %p1369_p11  ;;  %p1376_p1 = por %p1375_p0, %p1374_p13 }
 0x159   : > { %p1377_p2 = pnand %p1376_p1, %p1370_p12 }
 0x15b   : > { %1380 = shalt.err (!%p1377_p2)
}
 0x15c   : > { %s1381_s0 = scalar_lea.hbm %s1727_s9, 128  ;;  %s1385_s19 = scalar_lea.hbm %s1813_s4, 512 }
 0x15d   : > { %p1382_p4 = scmp.ne.s32.totalorder %s1727_s9, %s1381_s0  ;;  %p1386_p7 = scmp.lt.u32.totalorder %s1727_s9, %s1813_s4 }
 0x15e   : > { %p1387_p9 = scmp.lt.u32.totalorder %s1385_s19, %s1381_s0  ;;  %p1389_p11 = scmp.lt.u32.totalorder %s1381_s0, %s1727_s9 }
 0x15f   : > { %p1383_p5 = pnand %p1382_p4, %p1550_p3 }
 0x160   : > { %p1388_p10 = por %p1387_p9, %p1386_p7 }
 0x161   : > { %p1384_p6 = pneg %p1383_p5 }
 0x162   : > { %p1390_p12 = por %p1389_p11, %p1388_p10 }
 0x164   : > { %p1391_p13 = pnand %p1390_p12, %p1384_p6 }
 0x166   : > { %1394 = shalt.err (!%p1391_p13)
}
 0x167   : > { %1210 = dma.vmem_to_hbm [thread:$0]  (%p1550_p3), %s1729_s11, 128, %s1727_s9, %s822_s24  }
 0x168 PF: > { %p1224_p0 = scmp.ge.s32.totalorder %s1465_s22, 2  ;;  %s887_s12 = sand.u32 1, %s1437_s15  }
 0x169   : > { %s888_s10 = scalar_lea.sflag [#allocation3], %s887_s12 }
 0x16a   : > { %p1215_p1 = pnand %p1224_p0, %p1561_p8 }
 0x16c   : > { %1428 = dma.done.wait (!%p1215_p1), %s888_s10, 2048  }
 0x16d   : > { %1430 = vsyncadd (!%p1215_p1), %s888_s10, 4294965248  ;;  %s1826_s27 = sadd.s32 4294967294, %s1465_s22  }
 0x16e   : > { %s896_s30 = sand.u32 1, %s1826_s27  }
 0x16f   : > { %s897_s28 = scalar_lea.sflag [#allocation5], %s896_s30 }
 0x170   : > { %1432 = dma.done.wait (!%p1215_p1), %s897_s28, 256  }
 0x171   : > { %1434 = vsyncadd (!%p1215_p1), %s897_s28, 4294967040  ;;  %s21_s22 = sadd.s32 1, %s1465_s22   ;;  %s1827_s15 = smov %s1441_s16 }
 0x172   : > { %p18_p3 = scmp.ge.s32.totalorder %s21_s22, 6   ;;  %s1828_s16 = smov %s1445_s17 }
 0x173   : > { %s1829_s17 = smov %s1570_s7  ;;  %s1830_s18 = smov %s1457_s20 }
 0x174   : > { %s1831_s19 = smov %s1461_s21  ;;  %s1832_s20 = smov %s1835_s25 }
 0x175   : > { %s1833_s21 = smov %s1839_s26  ;;  %20 = sbr.rel (!%p18_p3) target bundleno = 10 (0xa), region = 97 }
 0x17c   :  { %911 = vsyncpa [#allocation3], 1 }
 0x17d   :  { %913 = vsyncpa [#allocation3 + $0x1], 1 }
 0x17e   :  { %914 = vsyncpa [#allocation5], 1 }
 0x17f   :  { %916 = vsyncpa [#allocation5 + $0x1], 1 }

</bundles_post_ra>
